<compile_context>
chip_gen: v5e
topology: v5e:2x2
jax: 0.10.0
libtpu: 0.0.40
codegen_flags: <defaults>
</compile_context>

<pallas_src>
import jax
import jax.numpy as jnp
from jax.experimental import pallas as pl
from jax.experimental.pallas import tpu as pltpu


def _sht_kernel(x_ref, y_ref, o_ref, acc_ref):
    # x_ref: (tm, tv)  y_ref: (tv, K_pad)  o_ref: (tm, K_pad)  acc_ref: (tm, K_pad) f32
    k = pl.program_id(1)

    @pl.when(k == 0)
    def _():
        acc_ref[...] = jnp.zeros_like(acc_ref)

    acc_ref[...] += jnp.dot(
        x_ref[...], y_ref[...], preferred_element_type=jnp.float32
    )

    @pl.when(k == pl.num_programs(1) - 1)
    def _():
        o_ref[...] = acc_ref[...].astype(o_ref.dtype)


def _round_up(x, m):
    return ((x + m - 1) // m) * m


def sht_forward(x, y_inv, area, L, *, tm=256, tv=512, compute_dtype=None):
    """SHT forward.

    x      : [B, C, V]
    y_inv  : [V, >= (L+1)**2]   (harmonic basis, constant)
    area   : [V]
    Returns: [B, C, (L+1)**2]
    """
    B, C, V = x.shape
    K = (L + 1) ** 2
    M = B * C

    # Fold area into the constant basis (one-time precompute in a real module;
    # kept in the wrapper here so the script stays self-contained).
    yw = (area[:, None] * y_inv[:, :K]).astype(jnp.float32)

    # Tile sizes: sublanes multiple of 8, lanes multiple of 128; clamp to data size.
    tm = min(tm, _round_up(M, 8))
    tv = min(tv, _round_up(V, 128))
    K_pad = _round_up(K, 128)          # lane-dense output (unmasked stores)
    M_pad = _round_up(M, tm)
    V_pad = _round_up(V, tv)

    dt = compute_dtype if compute_dtype is not None else x.dtype

    x2d = x.reshape(M, V).astype(dt)
    x2d = jnp.pad(x2d, ((0, M_pad - M), (0, V_pad - V)))
    yw = jnp.pad(yw, ((0, V_pad - V), (0, K_pad - K))).astype(dt)

    grid = (M_pad // tm, V_pad // tv)

    # Explicit VMEM budget (double-buffered tiles + f32 accumulator) with headroom,
    # kept well under the v7x 64 MiB per-TC capacity.
    itemsize = jnp.dtype(dt).itemsize
    vmem_bytes = (2 * tm * tv * itemsize        # x tiles (double buffered)
                  + 2 * tv * K_pad * itemsize   # basis tiles
                  + 2 * tm * K_pad * 4          # output tiles
                  + tm * K_pad * 4)             # accumulator
    vmem_limit = int(min(max(2 * vmem_bytes, 16 << 20), 48 << 20))

    out2d = pl.pallas_call(
        _sht_kernel,
        out_shape=jax.ShapeDtypeStruct((M_pad, K_pad), jnp.float32),
        grid_spec=pltpu.PrefetchScalarGridSpec(
            num_scalar_prefetch=0,
            grid=grid,
            in_specs=[
                pl.BlockSpec((tm, tv), lambda i, k: (i, k)),      # x rows (streamed)
                pl.BlockSpec((tv, K_pad), lambda i, k: (k, 0)),   # area-weighted basis
            ],
            out_specs=pl.BlockSpec((tm, K_pad), lambda i, k: (i, 0)),
            scratch_shapes=[pltpu.VMEM((tm, K_pad), jnp.float32)],
        ),
        compiler_params=pltpu.CompilerParams(
            dimension_semantics=("parallel", "arbitrary"),
            vmem_limit_bytes=vmem_limit,
        ),
    )(x2d, yw)

    return out2d[:M, :K].reshape(B, C, K).astype(x.dtype)


if __name__ == "__main__":
    # Small, deterministic synthetic setup (unaligned V and M to exercise padding).
    B, C, V = 2, 5, 300          # batch, channels, n_vertex  (M = 10, not 8-aligned)
    L = 3                        # bandwidth -> K = (L+1)**2 = 16
    K = (L + 1) ** 2

    key = jax.random.PRNGKey(0)
    kx, ky, ka = jax.random.split(key, 3)

    x = jax.random.normal(kx, (B, C, V), dtype=jnp.float32)
    # Synthetic harmonic basis (normally precomputed); shape [V, (L+1)**2 + extra].
    y_inv_full = jax.random.normal(ky, (V, K + 4), dtype=jnp.float32) * 0.1
    area = jax.random.uniform(ka, (V,), dtype=jnp.float32, minval=0.5, maxval=1.5)

    # Reference in plain JAX (mirrors the PyTorch forward exactly).
    ref = jnp.matmul(x * area[None, None, :], y_inv_full[:, :K])

    # 1) Default tiling (single reduction step at this toy V).
    out = jax.block_until_ready(sht_forward(x, y_inv_full, area, L))
    assert out.shape == (B, C, K)
    assert jnp.allclose(out, ref, atol=1e-4, rtol=1e-4), "mismatch vs reference (default tiles)"

    # 2) Small tiles to exercise the multi-step V-reduction accumulator path.
    out2 = jax.block_until_ready(sht_forward(x, y_inv_full, area, L, tm=8, tv=128))
    assert jnp.allclose(out2, ref, atol=1e-4, rtol=1e-4), "mismatch vs reference (tiled V)"

    print("KERNEL_OK")
</pallas_src>

<mosaic_0001>
module attributes {stable_mosaic.version = 11 : i64} {
  func.func @_sht_kernel(%arg0: i32, %arg1: i32, %arg2: memref<16x384xf32, #tpu.memory_space<vmem>>, %arg3: memref<384x128xf32, #tpu.memory_space<vmem>>, %arg4: memref<16x128xf32, #tpu.memory_space<vmem>>, %arg5: memref<16x128xf32, #tpu.memory_space<vmem>>) attributes {dimension_semantics = [#tpu.dimension_semantics<parallel>, #tpu.dimension_semantics<arbitrary>], iteration_bounds = array<i64: 1, 1>, scalar_prefetch = 0 : i64, scratch_operands = 1 : i64, tpu.core_type = #tpu.core_type<tc>, window_params = [{transform_indices = @transform_0, window_bounds = array<i64: 16, 384>}, {transform_indices = @transform_1, window_bounds = array<i64: 384, 128>}, {transform_indices = @transform_2, window_bounds = array<i64: 16, 128>}]} {
    %c0_i32 = arith.constant 0 : i32
    %0 = arith.cmpi eq, %arg1, %c0_i32 : i32
    %1 = arith.extui %0 : i1 to i32
    %c0_i32_0 = arith.constant 0 : i32
    %2 = arith.cmpi ne, %1, %c0_i32_0 : i32
    scf.if %2 {
      %cst_10 = arith.constant 0.000000e+00 : f32
      %12 = vector.broadcast %cst_10 : f32 to vector<16x128xf32>
      %c0_11 = arith.constant 0 : index
      %c0_12 = arith.constant 0 : index
      %13 = vector.load %arg5[%c0_11, %c0_12] : memref<16x128xf32, #tpu.memory_space<vmem>>, vector<16x128xf32>
      tpu.vector_store %arg5[%c0_11, %c0_12], %12 {strides = array<i32>} : memref<16x128xf32, #tpu.memory_space<vmem>>, vector<16x128xf32>,
    } else {
    }
    %c0 = arith.constant 0 : index
    %c0_1 = arith.constant 0 : index
    %3 = vector.load %arg5[%c0, %c0_1] : memref<16x128xf32, #tpu.memory_space<vmem>>, vector<16x128xf32>
    %c0_2 = arith.constant 0 : index
    %c0_3 = arith.constant 0 : index
    %4 = vector.load %arg2[%c0_2, %c0_3] : memref<16x384xf32, #tpu.memory_space<vmem>>, vector<16x384xf32>
    %c0_4 = arith.constant 0 : index
    %c0_5 = arith.constant 0 : index
    %5 = vector.load %arg3[%c0_4, %c0_5] : memref<384x128xf32, #tpu.memory_space<vmem>>, vector<384x128xf32>
    %cst = arith.constant dense<0.000000e+00> : vector<16x128xf32>
    %6 = tpu.matmul %4, %5, %cst {dimension_numbers = #tpu.dot_dimension_numbers<[1], [0], [0], [1], [0, 0, 1, 1], [], []>} : vector<16x384xf32>, vector<384x128xf32>, vector<16x128xf32> -> vector<16x128xf32>
    %7 = arith.addf %3, %6 : vector<16x128xf32>
    %c0_6 = arith.constant 0 : index
    %c0_7 = arith.constant 0 : index
    %8 = vector.load %arg5[%c0_6, %c0_7] : memref<16x128xf32, #tpu.memory_space<vmem>>, vector<16x128xf32>
    tpu.vector_store %arg5[%c0_6, %c0_7], %7 {strides = array<i32>} : memref<16x128xf32, #tpu.memory_space<vmem>>, vector<16x128xf32>,
    %c0_i32_8 = arith.constant 0 : i32
    %9 = arith.cmpi eq, %arg1, %c0_i32_8 : i32
    %10 = arith.extui %9 : i1 to i32
    %c0_i32_9 = arith.constant 0 : i32
    %11 = arith.cmpi ne, %10, %c0_i32_9 : i32
    scf.if %11 {
      %c0_10 = arith.constant 0 : index
      %c0_11 = arith.constant 0 : index
      %12 = vector.load %arg5[%c0_10, %c0_11] : memref<16x128xf32, #tpu.memory_space<vmem>>, vector<16x128xf32>
      %c0_12 = arith.constant 0 : index
      %c0_13 = arith.constant 0 : index
      %13 = vector.load %arg4[%c0_12, %c0_13] : memref<16x128xf32, #tpu.memory_space<vmem>>, vector<16x128xf32>
      tpu.vector_store %arg4[%c0_12, %c0_13], %12 {strides = array<i32>} : memref<16x128xf32, #tpu.memory_space<vmem>>, vector<16x128xf32>,
    } else {
    }
    return
  }
  func.func @transform_0(%arg0: i32, %arg1: i32) -> (i32, i32) {
    %c0_i32 = arith.constant 0 : i32
    return %arg0, %arg1 : i32, i32
  }
  func.func @transform_1(%arg0: i32, %arg1: i32) -> (i32, i32) {
    %c0_i32 = arith.constant 0 : i32
    %c0_i32_0 = arith.constant 0 : i32
    return %arg1, %c0_i32 : i32, i32
  }
  func.func @transform_2(%arg0: i32, %arg1: i32) -> (i32, i32) {
    %c0_i32 = arith.constant 0 : i32
    %c0_i32_0 = arith.constant 0 : i32
    return %arg0, %c0_i32 : i32, i32
  }
}

</mosaic_0001>

<bundles_post_ra>
// kernel: tpu_custom_call.1
= control target key start
LH: loop header
LB: loop body
LE: loop exit
PB: predicated region body
PF: predicated region fallthrough
CT: control target
= control target key end

     0   :  { %7 = vsyncpa [#allocation4], 0  ;;  %s344_s0 = inlined_call_operand.hbm [shape: f32[16,384], index: 0, kind: input, shape index: {}]   ;;  %s345_s1 = inlined_call_operand.hbm [shape: f32[384,128], index: 1, kind: input, shape index: {}]   ;;  %s346_s2 = inlined_call_operand.hbm [shape: f32[16,128], index: 2, kind: output, shape index: {}]  }
   0x1   :  { %8 = vsyncpa [#allocation7], 0 }
   0x2   :  { %9 = vsyncpa [#allocation5], 0  ;;  %s14_s11 = sshll.u32 %s344_s0, 4  ;;  %s307_s12 = smov [#allocation3]   ;;  %s15_s11 = int_to_ptr.hbm [resolvable:$true] %s14_s11 }
   0x3   :  { %s16_s13 = sshll.u32 %s307_s12, 4  ;;  %s27_s16 = sshll.u32 %s345_s1, 4  ;;  %s17_s13 = int_to_ptr.vmem [resolvable:$true] %s16_s13  ;;  %s28_s16 = int_to_ptr.hbm [resolvable:$true] %s27_s16 }
   0x4   :  { %s308_s17 = smov 384   ;;  %s309_s18 = smov 24  }
   0x5   :  { %22 = dma.hbm_to_vmem [thread:$0]  %s15_s11, 768, %s17_s13, [#allocation4], %s308_s17, %s308_s17, %s309_s18  }
   0x6   :  { %s310_s19 = smov [#allocation6]   ;;  %s311_s21 = smov 128  }
   0x7   :  { %s29_s20 = sshll.u32 %s310_s19, 4  ;;  %s312_s22 = smov 8   ;;  %s30_s20 = int_to_ptr.vmem [resolvable:$true] %s29_s20 }
   0x8   :  { %35 = dma.hbm_to_vmem [thread:$0]  %s28_s16, 6144, %s30_s20, [#allocation7], %s311_s21, %s311_s21, %s312_s22  }
   0x9   :  { %301 = dma.done.wait [#allocation4], 768  }
   0xa   :  { %302 = vsyncadd [#allocation4], 4294966528 }
   0xb   :  { %303 = dma.done.wait [#allocation7], 6144  }
   0xc   :  { %304 = vsyncadd [#allocation7], 4294961152  ;;  %v105_v0 = vld [vmem:[#allocation6 + $0x178] sm:$0xff]  ;;  %v104_v1 = vld [vmem:[#allocation6 + $0x170] sm:$0xff]  ;;  %s313_s0 = smov [#allocation8]   ;;  %s192_s25 = sshll.u32 %s346_s2, 4  ;;  %s193_s25 = int_to_ptr.hbm [resolvable:$true] %s192_s25 }
   0xd   :  { %v73_v2 = vld [vmem:[#allocation6 + $0x78] sm:$0xff]  ;;  %152 = vmatpush.msra.mxu2 %v105_v0  ;;  %v72_v4 = vld [vmem:[#allocation6 + $0x70] sm:$0xff]  ;;  %v103_v5 = vld [vmem:[#allocation6 + $0x168] sm:$0xff]  ;;  %s190_s1 = sshll.u32 %s313_s0, 4  ;;  %s191_s1 = int_to_ptr.vmem [resolvable:$true] %s190_s1 }
   0xe   :  { %106 = vmatpush.msra.mxu0 %v73_v2  ;;  %v89_v3 = vld [vmem:[#allocation6 + $0xf8] sm:$0xff]  ;;  %206 = vmatpush.msra.mxu3 %v73_v2  ;;  %v88_v6 = vld [vmem:[#allocation6 + $0xf0] sm:$0xff]  ;;  %v71_v7 = vld [vmem:[#allocation6 + $0x68] sm:$0xff] }
   0xf   :  { %129 = vmatpush.msra.mxu1 %v89_v3  ;;  %153 = vmatpush.msra.mxu2 %v104_v1  ;;  %v87_v8 = vld [vmem:[#allocation6 + $0xe8] sm:$0xff]  ;;  %v102_v9 = vld [vmem:[#allocation6 + $0x160] sm:$0xff]  ;;  %v101_v12 = vld [vmem:[#allocation6 + $0x158] sm:$0xff] }
  0x10   :  { %107 = vmatpush.msra.mxu0 %v72_v4  ;;  %207 = vmatpush.msra.mxu3 %v72_v4  ;;  %v70_v10 = vld [vmem:[#allocation6 + $0x60] sm:$0xff]  ;;  %v69_v13 = vld [vmem:[#allocation6 + $0x58] sm:$0xff]  ;;  %v100_v15 = vld [vmem:[#allocation6 + $0x150] sm:$0xff] }
  0x11   :  { %130 = vmatpush.msra.mxu1 %v88_v6  ;;  %154 = vmatpush.msra.mxu2 %v103_v5  ;;  %v86_v11 = vld [vmem:[#allocation6 + $0xe0] sm:$0xff]  ;;  %v85_v14 = vld [vmem:[#allocation6 + $0xd8] sm:$0xff]  ;;  %v68_v16 = vld [vmem:[#allocation6 + $0x50] sm:$0xff] }
  0x12   :  { %108 = vmatpush.msra.mxu0 %v71_v7  ;;  %208 = vmatpush.msra.mxu3 %v71_v7  ;;  %v84_v17 = vld [vmem:[#allocation6 + $0xd0] sm:$0xff]  ;;  %v99_v18 = vld [vmem:[#allocation6 + $0x148] sm:$0xff]  ;;  %v98_v21 = vld [vmem:[#allocation6 + $0x140] sm:$0xff] }
  0x13   :  { %131 = vmatpush.msra.mxu1 %v87_v8  ;;  %155 = vmatpush.msra.mxu2 %v102_v9  ;;  %v67_v19 = vld [vmem:[#allocation6 + $0x48] sm:$0xff]  ;;  %v66_v22 = vld [vmem:[#allocation6 + $0x40] sm:$0xff]  ;;  %v97_v24 = vld [vmem:[#allocation6 + $0x138] sm:$0xff] }
  0x14   :  { %109 = vmatpush.msra.mxu0 %v70_v10  ;;  %209 = vmatpush.msra.mxu3 %v70_v10  ;;  %v83_v20 = vld [vmem:[#allocation6 + $0xc8] sm:$0xff]  ;;  %v82_v23 = vld [vmem:[#allocation6 + $0xc0] sm:$0xff]  ;;  %v65_v25 = vld [vmem:[#allocation6 + $0x38] sm:$0xff] }
  0x15   :  { %132 = vmatpush.msra.mxu1 %v86_v11  ;;  %156 = vmatpush.msra.mxu2 %v101_v12  ;;  %v81_v26 = vld [vmem:[#allocation6 + $0xb8] sm:$0xff]  ;;  %v96_v27 = vld [vmem:[#allocation6 + $0x130] sm:$0xff]  ;;  %v95_v30 = vld [vmem:[#allocation6 + $0x128] sm:$0xff] }
  0x16   :  { %110 = vmatpush.msra.mxu0 %v69_v13  ;;  %210 = vmatpush.msra.mxu3 %v69_v13  ;;  %v64_v28 = vld [vmem:[#allocation6 + $0x30] sm:$0xff]  ;;  %v63_v31 = vld [vmem:[#allocation6 + $0x28] sm:$0xff]  ;;  %v94_v33 = vld [vmem:[#allocation6 + $0x120] sm:$0xff] }
  0x17   :  { %133 = vmatpush.msra.mxu1 %v85_v14  ;;  %157 = vmatpush.msra.mxu2 %v100_v15  ;;  %v80_v29 = vld [vmem:[#allocation6 + $0xb0] sm:$0xff]  ;;  %v79_v32 = vld [vmem:[#allocation6 + $0xa8] sm:$0xff]  ;;  %v62_v34 = vld [vmem:[#allocation6 + $0x20] sm:$0xff] }
  0x18   :  { %111 = vmatpush.msra.mxu0 %v68_v16  ;;  %211 = vmatpush.msra.mxu3 %v68_v16  ;;  %v78_v35 = vld [vmem:[#allocation6 + $0xa0] sm:$0xff]  ;;  %v93_v36 = vld [vmem:[#allocation6 + $0x118] sm:$0xff]  ;;  %v92_v39 = vld [vmem:[#allocation6 + $0x110] sm:$0xff] }
  0x19   :  { %134 = vmatpush.msra.mxu1 %v84_v17  ;;  %158 = vmatpush.msra.mxu2 %v99_v18  ;;  %v61_v37 = vld [vmem:[#allocation6 + $0x18] sm:$0xff]  ;;  %v60_v40 = vld [vmem:[#allocation6 + $0x10] sm:$0xff]  ;;  %v91_v42 = vld [vmem:[#allocation6 + $0x108] sm:$0xff] }
  0x1a   :  { %112 = vmatpush.msra.mxu0 %v67_v19  ;;  %212 = vmatpush.msra.mxu3 %v67_v19  ;;  %v77_v38 = vld [vmem:[#allocation6 + $0x98] sm:$0xff]  ;;  %v76_v41 = vld [vmem:[#allocation6 + $0x90] sm:$0xff]  ;;  %v59_v43 = vld [vmem:[#allocation6 + $0x8] sm:$0xff] }
  0x1b   :  { %135 = vmatpush.msra.mxu1 %v83_v20  ;;  %159 = vmatpush.msra.mxu2 %v98_v21  ;;  %v75_v44 = vld [vmem:[#allocation6 + $0x88] sm:$0xff]  ;;  %v90_v45 = vld [vmem:[#allocation6 + $0x100] sm:$0xff]  ;;  %v52_v49 = vld [vmem:[#allocation3] sm:$0xff] }
  0x1c   :  { %113 = vmatpush.msra.mxu0 %v66_v22  ;;  %213 = vmatpush.msra.mxu3 %v66_v22  ;;  %v58_v46 = vld [vmem:[#allocation6] sm:$0xff]  ;;  %v53_v50 = vld [vmem:[#allocation3 + $0x8] sm:$0xff]  ;;  %v55_v51 = vld [vmem:[#allocation3 + $0x18] sm:$0xff] }
  0x1d   :  { %136 = vmatpush.msra.mxu1 %v82_v23  ;;  %160 = vmatpush.msra.mxu2 %v97_v24  ;;  %v54_v47 = vld [vmem:[#allocation3 + $0x10] sm:$0xff]  ;;  %v57_v52 = vld [vmem:[#allocation3 + $0x28] sm:$0xff]  ;;  %v56_v53 = vld [vmem:[#allocation3 + $0x20] sm:$0xff] }
  0x1e   :  { %114 = vmatpush.msra.mxu0 %v65_v25  ;;  %214 = vmatpush.msra.mxu3 %v65_v25  ;;  %v74_v48 = vld [vmem:[#allocation6 + $0x80] sm:$0xff] }
  0x1f   :  { %137 = vmatpush.msra.mxu1 %v81_v26  ;;  %161 = vmatpush.msra.mxu2 %v96_v27 }
  0x20   :  { %115 = vmatpush.msra.mxu0 %v64_v28  ;;  %215 = vmatpush.msra.mxu3 %v64_v28 }
  0x21   :  { %138 = vmatpush.msra.mxu1 %v80_v29  ;;  %162 = vmatpush.msra.mxu2 %v95_v30 }
  0x22   :  { %116 = vmatpush.msra.mxu0 %v63_v31  ;;  %216 = vmatpush.msra.mxu3 %v63_v31 }
  0x23   :  { %139 = vmatpush.msra.mxu1 %v79_v32  ;;  %163 = vmatpush.msra.mxu2 %v94_v33 }
  0x24   :  { %117 = vmatpush.msra.mxu0 %v62_v34  ;;  %217 = vmatpush.msra.mxu3 %v62_v34 }
  0x25   :  { %140 = vmatpush.msra.mxu1 %v78_v35  ;;  %164 = vmatpush.msra.mxu2 %v93_v36 }
  0x26   :  { %118 = vmatpush.msra.mxu0 %v61_v37  ;;  %218 = vmatpush.msra.mxu3 %v61_v37 }
  0x27   :  { %141 = vmatpush.msra.mxu1 %v77_v38  ;;  %165 = vmatpush.msra.mxu2 %v92_v39 }
  0x28   :  { %119 = vmatpush.msra.mxu0 %v60_v40  ;;  %219 = vmatpush.msra.mxu3 %v60_v40 }
  0x29   :  { %142 = vmatpush.msra.mxu1 %v76_v41  ;;  %166 = vmatpush.msra.mxu2 %v91_v42 }
  0x2a   :  { %120 = vmatpush.msra.mxu0 %v59_v43  ;;  %220 = vmatpush.msra.mxu3 %v59_v43 }
  0x2b   :  { %143 = vmatpush.msra.mxu1 %v75_v44  ;;  %167 = vmatpush.msra.mxu2 %v90_v45 }
  0x2c   :  { %121 = vmatpush.msra.mxu0 %v58_v46  ;;  %168 = vmatmul.f32.vlgmr.msra.gmra.mxu2 %v54_v47 }
  0x2d   :  { %144 = vmatpush.msra.mxu1 %v74_v48  ;;  %122 = vmatmul.f32.vlgmr.msra.gmra.mxu0 %v52_v49 }
  0x2e   :  { %145 = vmatmul.f32.vlgmr.msra.gmra.mxu1 %v53_v50  ;;  %221 = vmatpush.msra.mxu3 %v58_v46 }
  0x2f   :  { %125 = vmatmul.f32.vlgmr.msra.gmra.mxu3 %v55_v51 }
  0x34   :  { %171 = vmatmul.f32.gmra.mxu2 %v57_v52 }
  0x36   :  { %148 = vmatmul.f32.gmra.mxu1 %v56_v53 }
  0xaa   :  { %v123_v54 = vpop.f32.mrf.mxu0 }
  0xab   :  { %v146_v55 = vpop.f32.mrf.mxu1 }
  0xac   :  { %v147_v56 = vadd.f32 %v146_v55, %v123_v54 }
  0xaf   :  { %v169_v57 = vpop.f32.mrf.mxu2 }
  0xb0   :  { %v170_v58 = vadd.f32 %v169_v57, %v147_v56 }
  0xb2   :  { %184 = vst [vmem:[#allocation8] sm:$0xff] %v170_v58  ;;  %v126_v59 = vpop.f32.mrf.mxu3 }
  0xb3   :  { %v149_v60 = vpop.f32.mrf.mxu1 }
  0xb4   :  { %v150_v61 = vadd.f32 %v149_v60, %v126_v59 }
  0xb7   :  { %v172_v62 = vpop.f32.mrf.mxu2 }
  0xb8   :  { %v173_v63 = vadd.f32 %v172_v62, %v150_v61 }
  0xba   :  { %185 = vst [vmem:[#allocation8 + $0x8] sm:$0xff] %v173_v63 }
  0xbb   :  { %198 = dma.vmem_to_hbm [thread:$0]  %s191_s1, 256, %s193_s25, [#allocation5], %s311_s21, %s311_s21, %s312_s22  }
  0xbc   :  { %305 = dma.done.wait [#allocation5], 256  }
  0xbd   :  { %306 = vsyncadd [#allocation5], 4294967040 }
  0xbe   :  { %203 = vsyncpa [#allocation4], 1 }
  0xbf   :  { %204 = vsyncpa [#allocation7], 1 }
  0xc0   :  { %205 = vsyncpa [#allocation5], 1 }

</bundles_post_ra>
